<compile_context>
chip_gen: v5e
topology: v5e:2x2
jax: 0.10.0
libtpu: 0.0.40
codegen_flags: <defaults>
</compile_context>

<pallas_src>
import functools
import math

import jax
import jax.numpy as jnp
from jax.experimental import pallas as pl
from jax.experimental.pallas import tpu as pltpu


# ----------------------------------------------------------------------------
# Kernels
# ----------------------------------------------------------------------------

def _packed_ln_kernel(x_ref, w_ref, sel_ref, selt_ref, o_ref, *, inv_c, eps):
    """Lane-dense BiasFree LayerNorm.

    x_ref   : (tg, G*C)  each physical row holds G logical rows of C channels
    w_ref   : (1,  G*C)  weight tiled G times (exact f32 element-wise multiply)
    sel_ref : (G*C, G)   0/1 selector, column g picks the lanes of group g
    selt_ref: (G,  G*C)  its transpose (broadcasts per-group scalars to lanes)
    """
    x = x_ref[...].astype(jnp.float32)                       # (tg, width)
    sel = sel_ref[...]
    selt = selt_ref[...]

    # One-pass statistics on the MXU (DEFAULT precision: one bf16 pass; the
    # 0/1 selector is exact in bf16, x/x^2 only see ~bf16 rounding in the sum).
    sum_x = jnp.dot(x, sel, preferred_element_type=jnp.float32)        # (tg,G)
    sum_x2 = jnp.dot(x * x, sel, preferred_element_type=jnp.float32)   # (tg,G)
    mean = sum_x * inv_c
    var = sum_x2 * inv_c - mean * mean        # population variance (ddof=0)
    # NOTE: E[x^2]-mean^2 cancels badly only when |mean| >> std; fine for
    # LayerNorm-style activations (validated against the f32 reference below).
    scale = jax.lax.rsqrt(var + eps)                                   # EUP

    # Broadcast the per-group scale back to lanes through the 0/1 selector.
    # hi/lo split of the *tiny* (tg, G) operand keeps f32 accuracy while both
    # matmuls stay at DEFAULT precision (no full-width splitting work).
    s_hi = scale.astype(jnp.bfloat16).astype(jnp.float32)
    s_lo = scale - s_hi
    scale_b = (jnp.dot(s_hi, selt, preferred_element_type=jnp.float32) +
               jnp.dot(s_lo, selt, preferred_element_type=jnp.float32))

    # BiasFree: scale the *un-centred* x, multiply by weight, no bias.
    o_ref[...] = (x * scale_b * w_ref[...]).astype(o_ref.dtype)


def _rowwise_ln_kernel(x_ref, w_ref, o_ref, *, eps):
    """Generic BiasFree LayerNorm (used when C is already a multiple of 128):
    channel sits on the lane axis, reductions go through the XLU."""
    x = x_ref[...].astype(jnp.float32)
    inv_c = 1.0 / x.shape[-1]
    mean = jnp.sum(x, axis=-1, keepdims=True) * inv_c
    ex2 = jnp.sum(x * x, axis=-1, keepdims=True) * inv_c
    var = ex2 - mean * mean
    o_ref[...] = (x * jax.lax.rsqrt(var + eps) * w_ref[...]).astype(o_ref.dtype)


# ----------------------------------------------------------------------------
# Tiling helpers
# ----------------------------------------------------------------------------

# Target footprint of the whole pipeline (2x in + 2x out double-buffers in the
# I/O dtype + ~3 live full-width f32 temporaries inside the body).
_VMEM_BUDGET = 24 * 1024 * 1024
# Explicit scoped-VMEM limit: v5e's default is only 16 MiB; 48 MiB still fits
# v7x's 64 MiB physical VMEM per TensorCore.
_VMEM_LIMIT = 48 * 1024 * 1024


def _cdiv(a, b):
    return -(-a // b)


def _round_up(a, b):
    return _cdiv(a, b) * b


def _pick_row_tile(nrows, row_io_bytes, row_f32_bytes):
    """Multiple-of-8 row tile: as large as the VMEM budget allows, but small
    enough to give >= 4 grid steps when the data is big enough (2 steps per
    v7x TensorCore, so each core still double-buffers)."""
    per_row = 4 * max(row_io_bytes, 1) + 3 * max(row_f32_bytes, 1)
    cap = max(8, (_VMEM_BUDGET // per_row) // 8 * 8)
    if nrows >= 32:
        cap = min(cap, max(8, _round_up(_cdiv(nrows, 4), 8)))
    return min(cap, _round_up(nrows, 8))


# ----------------------------------------------------------------------------
# Wrapper
# ----------------------------------------------------------------------------

def biasfree_layernorm(x, weight, eps=1e-5, packed=True):
    """BiasFree LayerNorm over the last axis.  x: (..., C), weight: (C,)."""
    orig_shape = x.shape
    c = int(orig_shape[-1])
    n = int(math.prod(orig_shape[:-1]))
    itemsize = jnp.dtype(x.dtype).itemsize
    x2 = x.reshape(n, c)
    w32 = weight.astype(jnp.float32)

    compiler_params = pltpu.CompilerParams(
        dimension_semantics=("parallel",),
        vmem_limit_bytes=_VMEM_LIMIT)

    g = 128 // math.gcd(c, 128)          # logical rows per physical row
    use_packed = packed and g > 1        # C % 128 != 0 -> lane-dense packing

    if use_packed:
        width = g * c                    # multiple of 128 -> unmasked vld/vst
        nr = _cdiv(n, g)
        tg = _pick_row_tile(nr, width * itemsize, width * 4)
        nr_pad = _round_up(nr, tg)
        pad_rows = nr_pad * g - n        # pad rows instead of losing packing
        if pad_rows:
            x2 = jnp.pad(x2, ((0, pad_rows), (0, 0)))
        xp = x2.reshape(nr_pad, width)   # free, contiguous reshape

        w_tiled = jnp.tile(w32, g).reshape(1, width)
        gid = jnp.arange(width, dtype=jnp.int32) // c
        sel = (gid[:, None] == jnp.arange(g, dtype=jnp.int32)[None, :]
               ).astype(jnp.float32)     # (width, g) 0/1 selector
        sel_t = sel.T                    # (g, width)

        out = pl.pallas_call(
            functools.partial(_packed_ln_kernel, inv_c=1.0 / c, eps=eps),
            out_shape=jax.ShapeDtypeStruct((nr_pad, width), x.dtype),
            grid=(nr_pad // tg,),
            in_specs=[pl.BlockSpec((tg, width), lambda i: (i, 0)),
                      pl.BlockSpec((1, width), lambda i: (0, 0)),
                      pl.BlockSpec((width, g), lambda i: (0, 0)),
                      pl.BlockSpec((g, width), lambda i: (0, 0))],
            out_specs=pl.BlockSpec((tg, width), lambda i: (i, 0)),
            compiler_params=compiler_params,
        )(xp, w_tiled, sel, sel_t)

        out = out.reshape(nr_pad * g, c)
        if pad_rows:
            out = out[:n]
        return out.reshape(orig_shape)

    # Generic path (lane-dense already when C % 128 == 0; also the fallback).
    tm = _pick_row_tile(n, c * itemsize, c * 4)
    n_pad = _round_up(n, tm)
    if n_pad != n:
        x2 = jnp.pad(x2, ((0, n_pad - n), (0, 0)))
    out = pl.pallas_call(
        functools.partial(_rowwise_ln_kernel, eps=eps),
        out_shape=jax.ShapeDtypeStruct((n_pad, c), x.dtype),
        grid=(n_pad // tm,),
        in_specs=[pl.BlockSpec((tm, c), lambda i: (i, 0)),
                  pl.BlockSpec((1, c), lambda i: (0, 0))],
        out_specs=pl.BlockSpec((tm, c), lambda i: (i, 0)),
        compiler_params=compiler_params,
    )(x2, w32.reshape(1, c))
    if n_pad != n:
        out = out[:n]
    return out.reshape(orig_shape)


# ----------------------------------------------------------------------------
# Pure-JAX reference (mirrors the PyTorch forward exactly)
# ----------------------------------------------------------------------------

def biasfree_layernorm_ref(x, weight, eps=1e-5):
    xf = x.astype(jnp.float32)
    var = jnp.var(xf, axis=-1, keepdims=True)      # ddof=0 == unbiased=False
    out = xf / jnp.sqrt(var + eps) * weight.astype(jnp.float32)
    return out.astype(x.dtype)


if __name__ == "__main__":
    key = jax.random.PRNGKey(0)
    kx, kw = jax.random.split(key)

    # fftformer applies this norm to (B, H*W, C) tokens; C=48 at the first
    # level.  B=2, H=W=16 -> 512 tokens of 48 channels.
    B, H, W, C = 2, 16, 16, 48
    x = jax.random.normal(kx, (B, H * W, C), jnp.float32)
    weight = 1.0 + 0.1 * jax.random.normal(kw, (C,), jnp.float32)

    try:
        out = jax.block_until_ready(jax.jit(biasfree_layernorm)(x, weight))
    except Exception:
        # Safety net: if this toolchain cannot lower the MXU-based packed
        # kernel, fall back to the generic row-wise kernel.
        out = jax.block_until_ready(
            jax.jit(functools.partial(biasfree_layernorm, packed=False))(
                x, weight))

    ref = biasfree_layernorm_ref(x, weight)
    assert out.shape == x.shape
    assert bool(jnp.all(jnp.isfinite(out)))
    err = float(jnp.max(jnp.abs(out.astype(jnp.float32) -
                                ref.astype(jnp.float32))))
    assert err < 1e-2, f"max abs error vs reference: {err}"
    print("KERNEL_OK")
</pallas_src>

<mosaic_0001>
module attributes {stable_mosaic.version = 11 : i64} {
  func.func @_packed_ln_kernel(%arg0: i32, %arg1: memref<16x384xf32, #tpu.memory_space<vmem>>, %arg2: memref<1x384xf32, #tpu.memory_space<vmem>>, %arg3: memref<384x8xf32, #tpu.memory_space<vmem>>, %arg4: memref<8x384xf32, #tpu.memory_space<vmem>>, %arg5: memref<16x384xf32, #tpu.memory_space<vmem>>) attributes {dimension_semantics = [#tpu.dimension_semantics<parallel>], iteration_bounds = array<i64: 4>, scalar_prefetch = 0 : i64, scratch_operands = 0 : i64, tpu.core_type = #tpu.core_type<tc>, window_params = [{transform_indices = @transform_0, window_bounds = array<i64: 16, 384>}, {pipeline_mode = #tpu.pipeline_mode<synchronous>, transform_indices = @transform_1, window_bounds = array<i64: 1, 384>}, {pipeline_mode = #tpu.pipeline_mode<synchronous>, transform_indices = @transform_2, window_bounds = array<i64: 384, 8>}, {pipeline_mode = #tpu.pipeline_mode<synchronous>, transform_indices = @transform_3, window_bounds = array<i64: 8, 384>}, {transform_indices = @transform_4, window_bounds = array<i64: 16, 384>}]} {
    %c0 = arith.constant 0 : index
    %c0_0 = arith.constant 0 : index
    %0 = vector.load %arg1[%c0, %c0_0] : memref<16x384xf32, #tpu.memory_space<vmem>>, vector<16x384xf32>
    %c0_1 = arith.constant 0 : index
    %c0_2 = arith.constant 0 : index
    %1 = vector.load %arg3[%c0_1, %c0_2] : memref<384x8xf32, #tpu.memory_space<vmem>>, vector<384x8xf32>
    %c0_3 = arith.constant 0 : index
    %c0_4 = arith.constant 0 : index
    %2 = vector.load %arg4[%c0_3, %c0_4] : memref<8x384xf32, #tpu.memory_space<vmem>>, vector<8x384xf32>
    %cst = arith.constant dense<0.000000e+00> : vector<16x8xf32>
    %3 = tpu.matmul %0, %1, %cst {dimension_numbers = #tpu.dot_dimension_numbers<[1], [0], [0], [1], [0, 0, 1, 1], [], []>} : vector<16x384xf32>, vector<384x8xf32>, vector<16x8xf32> -> vector<16x8xf32>
    %4 = arith.mulf %0, %0 : vector<16x384xf32>
    %cst_5 = arith.constant dense<0.000000e+00> : vector<16x8xf32>
    %5 = tpu.matmul %4, %1, %cst_5 {dimension_numbers = #tpu.dot_dimension_numbers<[1], [0], [0], [1], [0, 0, 1, 1], [], []>} : vector<16x384xf32>, vector<384x8xf32>, vector<16x8xf32> -> vector<16x8xf32>
    %cst_6 = arith.constant 0.020833334 : f32
    %6 = vector.broadcast %cst_6 : f32 to vector<16x8xf32>
    %7 = arith.mulf %3, %6 : vector<16x8xf32>
    %cst_7 = arith.constant 0.020833334 : f32
    %8 = vector.broadcast %cst_7 : f32 to vector<16x8xf32>
    %9 = arith.mulf %5, %8 : vector<16x8xf32>
    %10 = arith.mulf %7, %7 : vector<16x8xf32>
    %11 = arith.subf %9, %10 : vector<16x8xf32>
    %cst_8 = arith.constant 9.99999974E-6 : f32
    %12 = vector.broadcast %cst_8 : f32 to vector<16x8xf32>
    %13 = arith.addf %11, %12 : vector<16x8xf32>
    %14 = math.rsqrt %13 : vector<16x8xf32>
    %15 = arith.truncf %14 : vector<16x8xf32> to vector<16x8xbf16>
    %16 = arith.extf %15 : vector<16x8xbf16> to vector<16x8xf32>
    %17 = arith.subf %14, %16 : vector<16x8xf32>
    %cst_9 = arith.constant dense<0.000000e+00> : vector<16x384xf32>
    %18 = tpu.matmul %16, %2, %cst_9 {dimension_numbers = #tpu.dot_dimension_numbers<[1], [0], [0], [1], [0, 0, 1, 1], [], []>} : vector<16x8xf32>, vector<8x384xf32>, vector<16x384xf32> -> vector<16x384xf32>
    %cst_10 = arith.constant dense<0.000000e+00> : vector<16x384xf32>
    %19 = tpu.matmul %17, %2, %cst_10 {dimension_numbers = #tpu.dot_dimension_numbers<[1], [0], [0], [1], [0, 0, 1, 1], [], []>} : vector<16x8xf32>, vector<8x384xf32>, vector<16x384xf32> -> vector<16x384xf32>
    %20 = arith.addf %18, %19 : vector<16x384xf32>
    %21 = arith.mulf %0, %20 : vector<16x384xf32>
    %c0_11 = arith.constant 0 : index
    %c0_12 = arith.constant 0 : index
    %22 = vector.load %arg2[%c0_11, %c0_12] : memref<1x384xf32, #tpu.memory_space<vmem>>, vector<1x384xf32>
    %23 = vector.broadcast %22 : vector<1x384xf32> to vector<16x384xf32>
    %24 = arith.mulf %21, %23 : vector<16x384xf32>
    %c0_13 = arith.constant 0 : index
    %c0_14 = arith.constant 0 : index
    %25 = vector.load %arg5[%c0_13, %c0_14] : memref<16x384xf32, #tpu.memory_space<vmem>>, vector<16x384xf32>
    tpu.vector_store %arg5[%c0_13, %c0_14], %24 {strides = array<i32>} : memref<16x384xf32, #tpu.memory_space<vmem>>, vector<16x384xf32>,
    return
  }
  func.func @transform_0(%arg0: i32) -> (i32, i32) {
    %c0_i32 = arith.constant 0 : i32
    %c0_i32_0 = arith.constant 0 : i32
    return %arg0, %c0_i32 : i32, i32
  }
  func.func @transform_1(%arg0: i32) -> (i32, i32) {
    %c0_i32 = arith.constant 0 : i32
    %c0_i32_0 = arith.constant 0 : i32
    %c0_i32_1 = arith.constant 0 : i32
    return %c0_i32, %c0_i32_0 : i32, i32
  }
  func.func @transform_2(%arg0: i32) -> (i32, i32) {
    %c0_i32 = arith.constant 0 : i32
    %c0_i32_0 = arith.constant 0 : i32
    %c0_i32_1 = arith.constant 0 : i32
    return %c0_i32, %c0_i32_0 : i32, i32
  }
  func.func @transform_3(%arg0: i32) -> (i32, i32) {
    %c0_i32 = arith.constant 0 : i32
    %c0_i32_0 = arith.constant 0 : i32
    %c0_i32_1 = arith.constant 0 : i32
    return %c0_i32, %c0_i32_0 : i32, i32
  }
  func.func @transform_4(%arg0: i32) -> (i32, i32) {
    %c0_i32 = arith.constant 0 : i32
    %c0_i32_0 = arith.constant 0 : i32
    return %arg0, %c0_i32 : i32, i32
  }
}

module attributes {stable_mosaic.version = 11 : i64} {
  func.func @_rowwise_ln_kernel(%arg0: i32, %arg1: memref<128x48xf32, #tpu.memory_space<vmem>>, %arg2: memref<1x48xf32, #tpu.memory_space<vmem>>, %arg3: memref<128x48xf32, #tpu.memory_space<vmem>>) attributes {dimension_semantics = [#tpu.dimension_semantics<parallel>], iteration_bounds = array<i64: 4>, scalar_prefetch = 0 : i64, scratch_operands = 0 : i64, tpu.core_type = #tpu.core_type<tc>, window_params = [{transform_indices = @transform_0, window_bounds = array<i64: 128, 48>}, {pipeline_mode = #tpu.pipeline_mode<synchronous>, transform_indices = @transform_1, window_bounds = array<i64: 1, 48>}, {transform_indices = @transform_2, window_bounds = array<i64: 128, 48>}]} {
    %c0 = arith.constant 0 : index
    %c0_0 = arith.constant 0 : index
    %0 = vector.load %arg1[%c0, %c0_0] : memref<128x48xf32, #tpu.memory_space<vmem>>, vector<128x48xf32>
    %cst = arith.constant dense<0.000000e+00> : vector<128xf32>
    %1 = vector.multi_reduction <add>, %0, %cst [1] : vector<128x48xf32> to vector<128xf32>
    %2 = vector.shape_cast %1 : vector<128xf32> to vector<128x1xf32>
    %cst_1 = arith.constant 0.020833334 : f32
    %3 = vector.broadcast %cst_1 : f32 to vector<128x1xf32>
    %4 = arith.mulf %2, %3 : vector<128x1xf32>
    %5 = arith.mulf %0, %0 : vector<128x48xf32>
    %cst_2 = arith.constant dense<0.000000e+00> : vector<128xf32>
    %6 = vector.multi_reduction <add>, %5, %cst_2 [1] : vector<128x48xf32> to vector<128xf32>
    %7 = vector.shape_cast %6 : vector<128xf32> to vector<128x1xf32>
    %cst_3 = arith.constant 0.020833334 : f32
    %8 = vector.broadcast %cst_3 : f32 to vector<128x1xf32>
    %9 = arith.mulf %7, %8 : vector<128x1xf32>
    %10 = arith.mulf %4, %4 : vector<128x1xf32>
    %11 = arith.subf %9, %10 : vector<128x1xf32>
    %cst_4 = arith.constant 9.99999974E-6 : f32
    %12 = vector.broadcast %cst_4 : f32 to vector<128x1xf32>
    %13 = arith.addf %11, %12 : vector<128x1xf32>
    %14 = math.rsqrt %13 : vector<128x1xf32>
    %15 = vector.broadcast %14 : vector<128x1xf32> to vector<128x48xf32>
    %16 = arith.mulf %0, %15 : vector<128x48xf32>
    %c0_5 = arith.constant 0 : index
    %c0_6 = arith.constant 0 : index
    %17 = vector.load %arg2[%c0_5, %c0_6] : memref<1x48xf32, #tpu.memory_space<vmem>>, vector<1x48xf32>
    %18 = vector.broadcast %17 : vector<1x48xf32> to vector<128x48xf32>
    %19 = arith.mulf %16, %18 : vector<128x48xf32>
    %c0_7 = arith.constant 0 : index
    %c0_8 = arith.constant 0 : index
    %20 = vector.load %arg3[%c0_7, %c0_8] : memref<128x48xf32, #tpu.memory_space<vmem>>, vector<128x48xf32>
    tpu.vector_store %arg3[%c0_7, %c0_8], %19 {strides = array<i32>} : memref<128x48xf32, #tpu.memory_space<vmem>>, vector<128x48xf32>,
    return
  }
  func.func @transform_0(%arg0: i32) -> (i32, i32) {
    %c0_i32 = arith.constant 0 : i32
    %c0_i32_0 = arith.constant 0 : i32
    return %arg0, %c0_i32 : i32, i32
  }
  func.func @transform_1(%arg0: i32) -> (i32, i32) {
    %c0_i32 = arith.constant 0 : i32
    %c0_i32_0 = arith.constant 0 : i32
    %c0_i32_1 = arith.constant 0 : i32
    return %c0_i32, %c0_i32_0 : i32, i32
  }
  func.func @transform_2(%arg0: i32) -> (i32, i32) {
    %c0_i32 = arith.constant 0 : i32
    %c0_i32_0 = arith.constant 0 : i32
    return %arg0, %c0_i32 : i32, i32
  }
}

</mosaic_0001>

<bundles_post_ra>
// kernel: tile.9
= control target key start
LH: loop header
LB: loop body
LE: loop exit
PB: predicated region body
PF: predicated region fallthrough
CT: control target
= control target key end

     0   :  { %vm9_vm0 = vcmask 130048   ;;  %s102_s12 = smov 112   ;;  %s103_s13 = smov 80   ;;  %vm13_vm1 = vcmask 261120   ;;  %vm3_vm2 = vcmask 392192   ;;  %vm16_vm3 = vcmask 1048448   ;;  %s162_s0 = inlined_call_operand.vmem [shape: f32[8,48], index: 0, kind: input, shape index: {}]   ;;  %s163_s1 = inlined_call_operand.vmem [shape: f32[1,384], index: 1, kind: output, shape index: {}]  }
   0x1   :  { %v84_v0 = vld [vmem:[%s162_s0 + $0x5] sm:$0x1]   ;;  %v88_v3 = vld [vmem:[%s162_s0 + $0x7] sm:$0x1]   ;;  %v90_v4 = vld [vmem:[%s162_s0 + $0x1] sm:$0x1]  }
   0x2   :  { %v85_v1 = vld [vmem:[%s162_s0 + $0x5] sm:$0x1]   ;;  %34 = vrot.lane.b32.xlu1 %v88_v3, %s103_s13  ;;  %v86_v5 = vld [vmem:[%s162_s0 + $0x2] sm:$0x1]   ;;  %s104_s20 = smov 48   ;;  %s105_s25 = smov 96  }
   0x3   :  { %v10_v2 = vsel %vm9_vm0, %v85_v1, %v84_v0  ;;  %v87_v6 = vld [vmem:[%s162_s0 + $0x2] sm:$0x1]   ;;  %48 = vrot.lane.b32.xlu2 %v90_v4, %s104_s20  ;;  %v89_v8 = vld [vmem:[%s162_s0 + $0x4] sm:$0x1]   ;;  %v91_v9 = vld [vmem:[%s162_s0 + $0x6] sm:$0x1]  }
   0x4   :  { %11 = vrot.lane.b32.xlu0 %v10_v2, %s102_s12  ;;  %v24_v7 = vsel %vm13_vm1, %v87_v6, %v86_v5  ;;  %s106_s26 = smov 64   ;;  %s107_s27 = smov 32   ;;  %v92_v10 = vld [vmem:[%s162_s0 + $0x3] sm:$0x1]   ;;  %v2_v11 = vld [vmem:[%s162_s0] sm:$0x1]  }
   0x5   :  { %s108_s30 = smov 16   ;;  %4 = vst.msk [vmem:[#allocation0] sm:$0x1] %vm3_vm2, %v2_v11   ;;  %vm36_vm4 = vcmask 1048192   ;;  %vm56_vm5 = vcmask 654592   ;;  %vm30_vm6 = vcmask 1048320  }
   0x6   :  { %vm50_vm7 = vcmask 785792   ;;  %vm43_vm8 = vcmask 916992   ;;  %vm63_vm9 = vcmask 523392  }
   0xa   :  { %41 = vrot.lane.b32.xlu1 %v89_v8, %s106_s26 }
   0xb   :  { %54 = vrot.lane.b32.xlu2 %v91_v9, %s107_s27 }
   0xc   :  { %25 = vrot.lane.b32.xlu0 %v24_v7, %s105_s25 }
  0x14   :  { %61 = vrot.lane.b32.xlu0 %v92_v10, %s108_s30 }
  0x5d   :  { %v49_v12 = vpop.permute.xlu2 %48  }
  0x65   :  { %v55_v13 = vpop.permute.xlu2 %54  }
  0x74   :  { %v35_v15 = vpop.permute.xlu1 %34  }
  0x76   :  { %v12_v14 = vpop.permute.xlu0 %11  }
  0x77   :  { %15 = vst.msk [vmem:[#allocation0 + $0x10] sm:$0x1] %vm13_vm1, %v12_v14  }
  0x78   :  { %18 = vst.msk [vmem:[#allocation0 + $0x8] sm:$0x1] %vm16_vm3, %v12_v14  }
  0x79   :  { %38 = vst.msk [vmem:[#allocation0 + $0x10] sm:$0x1] %vm36_vm4, %v35_v15  }
  0x7a   :  { %58 = vst.msk [vmem:[#allocation0 + $0x10] sm:$0x1] %vm56_vm5, %v55_v13  }
  0x7c   :  { %v42_v17 = vpop.permute.xlu1 %41  }
  0x7e   :  { %v26_v16 = vpop.permute.xlu0 %25  }
  0x7f   :  { %29 = vst.msk [vmem:[#allocation0 + $0x8] sm:$0x1] %vm9_vm0, %v26_v16  }
  0x80   :  { %31 = vst.msk [vmem:[#allocation0] sm:$0x1] %vm30_vm6, %v26_v16  }
  0x81   :  { %51 = vst.msk [vmem:[#allocation0] sm:$0x1] %vm50_vm7, %v49_v12   ;;  %v79_v18 = vld [vmem:[#allocation0 + $0x10] sm:$0x1] }
  0x82   :  { %45 = vst.msk [vmem:[#allocation0 + $0x8] sm:$0x1] %vm43_vm8, %v42_v17  }
  0x83   :  { %94 = vst [vmem:[%s163_s1 + $0x2] sm:$0x1] %v79_v18 }
  0x86   :  { %v62_v19 = vpop.permute.xlu0 %61  }
  0x87   :  { %65 = vst.msk [vmem:[#allocation0 + $0x8] sm:$0x1] %vm63_vm9, %v62_v19  }
  0x88   :  { %v68_v20 = vld [vmem:[#allocation0] sm:$0x1] }
  0x89   :  { %71 = vst [vmem:[%s163_s1] sm:$0x1] %v68_v20 }
  0x8e   :  { %v73_v21 = vld [vmem:[#allocation0 + $0x8] sm:$0x1] }
  0x8f   :  { %93 = vst [vmem:[%s163_s1 + $0x1] sm:$0x1] %v73_v21 }

// kernel: tile.8
= control target key start
LH: loop header
LB: loop body
LE: loop exit
PB: predicated region body
PF: predicated region fallthrough
CT: control target
= control target key end

     0   :  { %s22_s0 = inlined_call_operand.vmem [shape: f32[48], index: 0, kind: input, shape index: {}]   ;;  %s23_s1 = inlined_call_operand.vmem [shape: f32[8,48], index: 1, kind: output, shape index: {}]  }
   0x1   :  { %v4_v0 = vld [vmem:[%s22_s0] ss:$0 sm:$0xff] }
   0x2   :  { %5 = vst [vmem:[%s23_s1] sm:$0xff] %v4_v0 }

// kernel: biasfree_layernorm.1
= control target key start
LH: loop header
LB: loop body
LE: loop exit
PB: predicated region body
PF: predicated region fallthrough
CT: control target
= control target key end

     0   :  { %s749_s15 = smov 0   ;;  %s1108_s0 = inlined_call_operand.vmem [shape: f32[64,384], index: 0, kind: input, shape index: {}]   ;;  %s1109_s1 = inlined_call_operand.vmem [shape: f32[1,384], index: 1, kind: input, shape index: {}]   ;;  %s1110_s2 = inlined_call_operand.vmem [shape: f32[384,8], index: 2, kind: input, shape index: {}]   ;;  %s1111_s3 = inlined_call_operand.vmem [shape: f32[8,384], index: 3, kind: input, shape index: {}]   ;;  %s1112_s4 = inlined_call_operand.vmem [shape: f32[64,384], index: 4, kind: output, shape index: {}]  }
   0x1 LB: > { %s678_s16 = sadd.s32 4294967295, %s722_s15   ;;  %p682_p0 = scmp.ge.s32.totalorder %s722_s15, 1  ;;  %s722_s15 = sphi %s749_s15, %s14_s15  }
   0x2   : > { %p164_p1 = scmp.lt.s32.totalorder %s722_s15, 5 }
   0x4   : > { %p165_p2 = pnand %p682_p0, %p164_p1 }
   0x5   : > { %s683_s19 = sshll.u32 (!%p165_p2), %s678_s16, 1 }
   0x6   : > { %168 = sbr.rel (%p165_p2) target bundleno = 407 (0x197), region = 36  ;;  %p193_p3 = scmp.lt.s32.totalorder (!%p165_p2), %s683_s19, 7 }
   0xb   : > { %v227_v0 = vld [vmem:[%s1110_s2 + $0x78] sm:$0xff]  ;;  %v226_v1 = vld [vmem:[%s1110_s2 + $0x70] sm:$0xff]  ;;  %v225_v4 = vld [vmem:[%s1110_s2 + $0x68] sm:$0xff]  ;;  %s1114_s19 = smov (!%p193_p3, %s683_s19), 7  ;;  %vm443_vm3 = vcmask 64512  }
   0xc   : > { %v766_v2 = vld [vmem:[%s1110_s2 + $0xf8] sm:$0xff]  ;;  %263 = vmatpush.msra.mxu0 %v227_v0  ;;  %v772_v3 = vld [vmem:[%s1110_s2 + $0xf0] sm:$0xff]  ;;  %v780_v5 = vld [vmem:[%s1110_s2 + $0xe8] sm:$0xff]  ;;  %338 = vmatpush.msra.mxu3 %v227_v0  ;;  %s703_s27 = smul.u32 24, %s1114_s19 }
   0xd   : > { %286 = vmatpush.msra.mxu1 %v766_v2  ;;  %v786_v6 = vld [vmem:[%s1110_s2 + $0x178] sm:$0xff]  ;;  %v224_v7 = vld [vmem:[%s1110_s2 + $0x60] sm:$0xff]  ;;  %v800_v9 = vld [vmem:[%s1110_s2 + $0x170] sm:$0xff] }
   0xe   : > { %264 = vmatpush.msra.mxu0 %v226_v1  ;;  %v794_v8 = vld [vmem:[%s1110_s2 + $0xe0] sm:$0xff]  ;;  %309 = vmatpush.msra.mxu2 %v786_v6  ;;  %v806_v10 = vld [vmem:[%s1110_s2 + $0x168] sm:$0xff]  ;;  %v223_v11 = vld [vmem:[%s1110_s2 + $0x58] sm:$0xff]  ;;  %s990_s14 = scalar_lea.vmem %s1108_s0, %s703_s27  ;;  %s1092_s6 = scalar_lea.vmem %s1112_s4, %s703_s27 }
   0xf   : > { %287 = vmatpush.msra.mxu1 %v772_v3  ;;  %339 = vmatpush.msra.mxu3 %v226_v1  ;;  %v814_v12 = vld [vmem:[%s1110_s2 + $0xd8] sm:$0xff]  ;;  %v821_v13 = vld [vmem:[%s1110_s2 + $0x160] sm:$0xff]  ;;  %v222_v14 = vld [vmem:[%s1110_s2 + $0x50] sm:$0xff] }
  0x10   : > { %265 = vmatpush.msra.mxu0 %v225_v4  ;;  %310 = vmatpush.msra.mxu2 %v800_v9  ;;  %v829_v15 = vld [vmem:[%s1110_s2 + $0xd0] sm:$0xff]  ;;  %v836_v16 = vld [vmem:[%s1110_s2 + $0x158] sm:$0xff]  ;;  %v221_v17 = vld [vmem:[%s1110_s2 + $0x48] sm:$0xff] }
  0x11   : > { %288 = vmatpush.msra.mxu1 %v780_v5  ;;  %340 = vmatpush.msra.mxu3 %v225_v4  ;;  %v844_v18 = vld [vmem:[%s1110_s2 + $0xc8] sm:$0xff]  ;;  %v851_v19 = vld [vmem:[%s1110_s2 + $0x150] sm:$0xff]  ;;  %v220_v20 = vld [vmem:[%s1110_s2 + $0x40] sm:$0xff] }
  0x12   : > { %266 = vmatpush.msra.mxu0 %v224_v7  ;;  %311 = vmatpush.msra.mxu2 %v806_v10  ;;  %v859_v21 = vld [vmem:[%s1110_s2 + $0xc0] sm:$0xff]  ;;  %v866_v22 = vld [vmem:[%s1110_s2 + $0x148] sm:$0xff]  ;;  %v219_v23 = vld [vmem:[%s1110_s2 + $0x38] sm:$0xff] }
  0x13   : > { %289 = vmatpush.msra.mxu1 %v794_v8  ;;  %341 = vmatpush.msra.mxu3 %v224_v7  ;;  %v874_v24 = vld [vmem:[%s1110_s2 + $0xb8] sm:$0xff]  ;;  %v883_v25 = vld [vmem:[%s1110_s2 + $0x140] sm:$0xff]  ;;  %v218_v26 = vld [vmem:[%s1110_s2 + $0x30] sm:$0xff] }
  0x14   : > { %267 = vmatpush.msra.mxu0 %v223_v11  ;;  %312 = vmatpush.msra.mxu2 %v821_v13  ;;  %v891_v27 = vld [vmem:[%s1110_s2 + $0xb0] sm:$0xff]  ;;  %v898_v28 = vld [vmem:[%s1110_s2 + $0x138] sm:$0xff]  ;;  %v217_v29 = vld [vmem:[%s1110_s2 + $0x28] sm:$0xff] }
  0x15   : > { %290 = vmatpush.msra.mxu1 %v814_v12  ;;  %342 = vmatpush.msra.mxu3 %v223_v11  ;;  %v906_v30 = vld [vmem:[%s1110_s2 + $0xa8] sm:$0xff]  ;;  %v913_v31 = vld [vmem:[%s1110_s2 + $0x130] sm:$0xff]  ;;  %v216_v32 = vld [vmem:[%s1110_s2 + $0x20] sm:$0xff] }
  0x16   : > { %268 = vmatpush.msra.mxu0 %v222_v14  ;;  %313 = vmatpush.msra.mxu2 %v836_v16  ;;  %v921_v33 = vld [vmem:[%s1110_s2 + $0xa0] sm:$0xff]  ;;  %v928_v34 = vld [vmem:[%s1110_s2 + $0x128] sm:$0xff]  ;;  %v215_v35 = vld [vmem:[%s1110_s2 + $0x18] sm:$0xff] }
  0x17   : > { %291 = vmatpush.msra.mxu1 %v829_v15  ;;  %343 = vmatpush.msra.mxu3 %v222_v14  ;;  %v939_v36 = vld [vmem:[%s1110_s2 + $0x98] sm:$0xff]  ;;  %v946_v37 = vld [vmem:[%s1110_s2 + $0x120] sm:$0xff]  ;;  %v214_v38 = vld [vmem:[%s1110_s2 + $0x10] sm:$0xff] }
  0x18   : > { %269 = vmatpush.msra.mxu0 %v221_v17  ;;  %314 = vmatpush.msra.mxu2 %v851_v19  ;;  %v954_v39 = vld [vmem:[%s1110_s2 + $0x90] sm:$0xff]  ;;  %v961_v40 = vld [vmem:[%s1110_s2 + $0x118] sm:$0xff]  ;;  %v213_v41 = vld [vmem:[%s1110_s2 + $0x8] sm:$0xff] }
  0x19   : > { %292 = vmatpush.msra.mxu1 %v844_v18  ;;  %344 = vmatpush.msra.mxu3 %v221_v17  ;;  %v970_v42 = vld [vmem:[%s1110_s2 + $0x88] sm:$0xff]  ;;  %v246_v43 = vld [vmem:[%s1110_s2 + $0x110] sm:$0xff]  ;;  %v212_v44 = vld [vmem:[%s1110_s2] sm:$0xff] }
  0x1a   : > { %270 = vmatpush.msra.mxu0 %v220_v20  ;;  %315 = vmatpush.msra.mxu2 %v866_v22  ;;  %v228_v45 = vld [vmem:[%s1110_s2 + $0x80] sm:$0xff]  ;;  %v245_v46 = vld [vmem:[%s1110_s2 + $0x108] sm:$0xff]  ;;  %v1010_v50 = vld [vmem:[%s990_s14 + $0x10] sm:$0xff] }
  0x1b   : > { %293 = vmatpush.msra.mxu1 %v859_v21  ;;  %345 = vmatpush.msra.mxu3 %v220_v20  ;;  %v996_v47 = vld [vmem:[%s990_s14] sm:$0xff]  ;;  %v1004_v49 = vld [vmem:[%s990_s14 + $0x8] sm:$0xff]  ;;  %v1021_v52 = vld [vmem:[%s990_s14 + $0x18] sm:$0xff]  ;;  %v334_v57 = vmul.f32 %v1010_v50, %v1010_v50 }
  0x1c   : > { %271 = vmatpush.msra.mxu0 %v219_v23  ;;  %316 = vmatpush.msra.mxu2 %v883_v25  ;;  %v244_v48 = vld [vmem:[%s1110_s2 + $0x100] sm:$0xff]  ;;  %v332_v51 = vmul.f32 %v996_v47, %v996_v47  ;;  %v1032_v54 = vld [vmem:[%s990_s14 + $0x28] sm:$0xff]  ;;  %v335_v55 = vmul.f32 %v1021_v52, %v1021_v52  ;;  %v333_v56 = vmul.f32 %v1004_v49, %v1004_v49 }
  0x1d   : > { %294 = vmatpush.msra.mxu1 %v874_v24  ;;  %346 = vmatpush.msra.mxu3 %v219_v23  ;;  %v1026_v53 = vld [vmem:[%s990_s14 + $0x20] sm:$0xff]  ;;  %v337_v59 = vmul.f32 %v1032_v54, %v1032_v54  ;;  %v261_v4 = vld [vmem:[%s1111_s3 + $0x8] sm:$0xff] }
  0x1e   : > { %272 = vmatpush.msra.mxu0 %v218_v26  ;;  %317 = vmatpush.msra.mxu2 %v898_v28  ;;  %v336_v58 = vmul.f32 %v1026_v53, %v1026_v53 }
  0x1f   : > { %295 = vmatpush.msra.mxu1 %v891_v27  ;;  %347 = vmatpush.msra.mxu3 %v218_v26 }
  0x20   : > { %273 = vmatpush.msra.mxu0 %v217_v29  ;;  %318 = vmatpush.msra.mxu2 %v913_v31 }
  0x21   : > { %296 = vmatpush.msra.mxu1 %v906_v30  ;;  %348 = vmatpush.msra.mxu3 %v217_v29 }
  0x22   : > { %274 = vmatpush.msra.mxu0 %v216_v32  ;;  %319 = vmatpush.msra.mxu2 %v928_v34 }
  0x23   : > { %297 = vmatpush.msra.mxu1 %v921_v33  ;;  %349 = vmatpush.msra.mxu3 %v216_v32 }
  0x24   : > { %275 = vmatpush.msra.mxu0 %v215_v35  ;;  %320 = vmatpush.msra.mxu2 %v946_v37 }
  0x25   : > { %298 = vmatpush.msra.mxu1 %v939_v36  ;;  %350 = vmatpush.msra.mxu3 %v215_v35 }
  0x26   : > { %276 = vmatpush.msra.mxu0 %v214_v38  ;;  %321 = vmatpush.msra.mxu2 %v961_v40 }
  0x27   : > { %299 = vmatpush.msra.mxu1 %v954_v39  ;;  %351 = vmatpush.msra.mxu3 %v214_v38 }
  0x28   : > { %277 = vmatpush.msra.mxu0 %v213_v41  ;;  %322 = vmatpush.msra.mxu2 %v246_v43 }
  0x29   : > { %300 = vmatpush.msra.mxu1 %v970_v42  ;;  %352 = vmatpush.msra.mxu3 %v213_v41 }
  0x2a   : > { %278 = vmatpush.msra.mxu0 %v212_v44  ;;  %323 = vmatpush.msra.mxu2 %v245_v46 }
  0x2b   : > { %301 = vmatpush.msra.mxu1 %v228_v45  ;;  %279 = vmatmul.f32.vlgmr.msra.gmra.mxu0 %v996_v47 }
  0x2c   : > { %361 = vmatpush.msrb.mxu0 %v766_v2  ;;  %324 = vmatpush.msra.mxu2 %v244_v48 }
  0x2d   : > { %384 = vmatpush.msrb.mxu1 %v786_v6  ;;  %325 = vmatmul.f32.vlgmr.msra.gmra.mxu2 %v1010_v50 }
  0x2e   : > { %362 = vmatpush.msrb.mxu0 %v772_v3  ;;  %302 = vmatmul.f32.vlgmr.msra.gmra.mxu1 %v1004_v49 }
  0x2f   : > { %385 = vmatpush.msrb.mxu1 %v800_v9  ;;  %353 = vmatpush.msra.mxu3 %v212_v44 }
  0x30   : > { %363 = vmatpush.msrb.mxu0 %v780_v5  ;;  %354 = vmatmul.f32.vlgmr.msra.gmra.mxu3 %v332_v51  ;;  %v262_v5 = vld [vmem:[%s1111_s3 + $0x10] sm:$0xff] }
  0x31   : > { %386 = vmatpush.msrb.mxu1 %v806_v10  ;;  %488 = vmatpush.msrb.mxu3 %v261_v4 }
  0x32   : > { %364 = vmatpush.msrb.mxu0 %v794_v8  ;;  %v260_v8 = vld [vmem:[%s1111_s3] sm:$0xff] }
  0x33   : > { %387 = vmatpush.msrb.mxu1 %v821_v13  ;;  %282 = vmatmul.f32.gmra.mxu0 %v1021_v52 }
  0x34   : > { %365 = vmatpush.msrb.mxu0 %v814_v12  ;;  %465 = vmatpush.msrb.mxu2 %v260_v8 }
  0x35   : > { %388 = vmatpush.msrb.mxu1 %v836_v16  ;;  %328 = vmatmul.f32.gmra.mxu2 %v1032_v54 }
  0x36   : > { %366 = vmatpush.msrb.mxu0 %v829_v15  ;;  %305 = vmatmul.f32.gmra.mxu1 %v1026_v53 }
  0x37   : > { %389 = vmatpush.msrb.mxu1 %v851_v19  ;;  %511 = vmatpush.msra.mxu2 %v262_v5 }
  0x38   : > { %367 = vmatpush.msrb.mxu0 %v844_v18  ;;  %357 = vmatmul.f32.gmra.mxu3 %v335_v55  ;;  %v600_v55 = vld [vmem:[%s1109_s1] sm:$0x7] }
  0x39   : > { %390 = vmatpush.msrb.mxu1 %v866_v22  ;;  %540 = vmatpush.msra.mxu3 %v260_v8 }
  0x3a   : > { %368 = vmatpush.msrb.mxu0 %v859_v21 }
  0x3b   : > { %391 = vmatpush.msrb.mxu1 %v883_v25 }
  0x3c   : > { %369 = vmatpush.msrb.mxu0 %v874_v24 }
  0x3d   : > { %392 = vmatpush.msrb.mxu1 %v898_v28 }
  0x3e   : > { %370 = vmatpush.msrb.mxu0 %v891_v27 }
  0x3f   : > { %393 = vmatpush.msrb.mxu1 %v913_v31 }
  0x40   : > { %371 = vmatpush.msrb.mxu0 %v906_v30 }
  0x41   : > { %394 = vmatpush.msrb.mxu1 %v928_v34 }
  0x42   : > { %372 = vmatpush.msrb.mxu0 %v921_v33 }
  0x43   : > { %395 = vmatpush.msrb.mxu1 %v946_v37 }
  0x44   : > { %373 = vmatpush.msrb.mxu0 %v939_v36 }
  0x45   : > { %396 = vmatpush.msrb.mxu1 %v961_v40 }
  0x46   : > { %374 = vmatpush.msrb.mxu0 %v954_v39 }
  0x47   : > { %397 = vmatpush.msrb.mxu1 %v246_v43 }
  0x48   : > { %375 = vmatpush.msrb.mxu0 %v970_v42 }
  0x49   : > { %398 = vmatpush.msrb.mxu1 %v245_v46 }
  0x4a   : > { %376 = vmatpush.msrb.mxu0 %v228_v45 }
  0x4b   : > { %399 = vmatpush.msrb.mxu1 %v244_v48  ;;  %377 = vmatmul.f32.vlgmr.msrb.gmra.mxu0 %v333_v56 }
  0x4c   : > { %400 = vmatmul.f32.vlgmr.msrb.gmra.mxu1 %v334_v57  ;;  %563 = vmatpush.msra.mxu0 %v261_v4 }
  0x4d   : > { %586 = vmatpush.msra.mxu1 %v262_v5 }
  0x53   : > { %380 = vmatmul.f32.gmra.mxu0 %v336_v58 }
  0x54   : > { %403 = vmatmul.f32.gmra.mxu1 %v337_v59 }
  0xa8   : > { %v280_v60 = vpop.f32.mrf.mxu0 }
  0xab   : > { %v303_v61 = vpop.f32.mrf.mxu1 }
  0xac   : > { %v304_v1 = vadd.f32 %v303_v61, %v280_v60  ;;  %v603_v60 = vperm.slane %v600_v55, 1 }
  0xb0   : > { %v283_v62 = vpop.f32.mrf.mxu0  ;;  %v326_v63 = vpop.f32.mrf.mxu2 }
  0xb1   : > { %v327_v3 = vadd.f32 %v326_v63, %v304_v1 }
  0xb3   : > { %v306_v0 = vpop.f32.mrf.mxu1  ;;  %v355_v2 = vpop.f32.mrf.mxu3  ;;  %v407_v9 = vmul.f32 0.020833334, %v327_v3 }
  0xb4   : > { %v307_v10 = vadd.f32 %v306_v0, %v283_v62 }
  0xb5   : > { %v411_v14 = vmul.f32 %v407_v9, %v407_v9 }
  0xb8   : > { %v329_v12 = vpop.f32.mrf.mxu2 }
  0xb9   : > { %v330_v15 = vadd.f32 %v329_v12, %v307_v10 }
  0xbb   : > { %v358_v17 = vpop.f32.mrf.mxu3  ;;  %v408_v21 = vmul.f32 0.020833334, %v330_v15 }
  0xbd   : > { %v412_v25 = vmul.f32 %v408_v21, %v408_v21 }
  0xc8   : > { %v378_v6 = vpop.f32.mrf.mxu0 }
  0xc9   : > { %v401_v7 = vpop.f32.mrf.mxu1  ;;  %v379_v11 = vadd.f32 %v378_v6, %v355_v2  ;;  %v602_v6 = vperm.slane %v600_v55, 0 }
  0xcb   : > { %v402_v13 = vadd.f32 %v401_v7, %v379_v11 }
  0xcd   : > { %v409_v16 = vmul.f32 0.020833334, %v402_v13 }
  0xcf   : > { %v413_v18 = vsub.f32 %v409_v16, %v411_v14 }
  0xd0   : > { %v381_v19 = vpop.f32.mrf.mxu0 }
  0xd1   : > { %v404_v20 = vpop.f32.mrf.mxu1  ;;  %v415_v22 = vadd.f32 1e-05, %v413_v18  ;;  %v382_v23 = vadd.f32 %v381_v19, %v358_v17 }
  0xd3   : > { %712 = vrsqrt.f32 %v415_v22  ;;  %v405_v24 = vadd.f32 %v404_v20, %v382_v23  ;;  %vm423_vm1 = vweird.f32 %v415_v22 }
  0xd5   : > { %v410_v26 = vmul.f32 0.020833334, %v405_v24 }
  0xd7   : > { %v414_v27 = vsub.f32 %v410_v26, %v412_v25 }
  0xd9   : > { %v713_v28 = vpop.eup %712  ;;  %v416_v29 = vadd.f32 1e-05, %v414_v27 }
  0xda   : > { %v418_v30 = vmul.f32 %v713_v28, %v415_v22  ;;  %vm424_vm0 = vweird.f32 %v713_v28 }
  0xdb   : > { %714 = vrsqrt.f32 %v416_v29  ;;  %vm425_vm2 = vmor %vm423_vm1, %vm424_vm0  ;;  %vm433_vm5 = vweird.f32 %v416_v29 }
  0xdc   : > { %v419_v31 = vmul.f32 %v713_v28, %v418_v30 }
  0xde   : > { %v420_v32 = vmul.f32 0.5, %v419_v31 }
  0xe0   : > { %v421_v33 = vsub.f32 1.5, %v420_v32 }
  0xe1   : > { %v715_v34 = vpop.eup %714 }
  0xe2   : > { %v422_v35 = vmul.f32 %v713_v28, %v421_v33  ;;  %v428_v36 = vmul.f32 %v715_v34, %v416_v29  ;;  %vm434_vm4 = vweird.f32 %v715_v34 }
  0xe3   : > { %vm435_vm6 = vmor %vm433_vm5, %vm434_vm4 }
  0xe4   : > { %v426_v37 = vsel %vm425_vm2, %v713_v28, %v422_v35  ;;  %v429_v38 = vmul.f32 %v715_v34, %v428_v36 }
  0xe5   : > { %v437_v39 = vpack.c.bf16 %v426_v37, %v426_v37 }
  0xe6   : > { %v430_v40 = vmul.f32 0.5, %v429_v38 }
  0xe7   : > { %v439_v41 = vunpack.c.l.bf16 %v437_v39 }
  0xe8   : > { %v431_v42 = vsub.f32 1.5, %v430_v40 }
  0xe9   : > { %695 = vmatmul.msk.f32.vlgmr.msra.gmra.mxu0 %vm443_vm3, %v439_v41  ;;  %697 = vmatmul.msk.f32.vlgmr.msra.gmra.mxu1 %vm443_vm3, %v439_v41  ;;  %v441_v43 = vsub.f32 %v426_v37, %v439_v41 }
  0xea   : > { %v432_v44 = vmul.f32 %v715_v34, %v431_v42 }
  0xeb   : > { %687 = vmatmul.msk.f32.vlgmr.msrb.gmra.mxu2 %vm443_vm3, %v441_v43  ;;  %689 = vmatmul.msk.f32.vlgmr.msrb.gmra.mxu3 %vm443_vm3, %v441_v43 }
  0xec   : > { %v436_v45 = vsel %vm435_vm6, %v715_v34, %v432_v44  ;;  %701 = vmatpush.msrb.mxu2 %v261_v4  ;;  %702 = vmatpush.msrb.mxu3 %v262_v5  ;;  %v604_v5 = vperm.slane %v600_v55, 2 }
  0xed   : > { %v438_v46 = vpack.c.bf16 %v436_v45, %v436_v45 }
  0xef   : > { %v440_v48 = vunpack.c.l.bf16 %v438_v46 }
  0xf1   : > { %v442_v51 = vsub.f32 %v436_v45, %v440_v48 }
  0xf3   : > { %688 = vmatmul.msk.f32.gmra.mxu2 %vm443_vm3, %v442_v51  ;;  %690 = vmatmul.msk.f32.gmra.mxu3 %vm443_vm3, %v442_v51 }
  0xfb   : > { %691 = vmatmul.msk.f32.vlgmr.msra.gmra.mxu2 %vm443_vm3, %v441_v43  ;;  %693 = vmatmul.msk.f32.vlgmr.msra.gmra.mxu3 %vm443_vm3, %v439_v41 }
 0x103   : > { %692 = vmatmul.msk.f32.gmra.mxu2 %vm443_vm3, %v442_v51  ;;  %694 = vmatmul.msk.f32.gmra.mxu3 %vm443_vm3, %v440_v48 }
 0x10b   : > { %696 = vmatmul.msk.f32.vlgmr.msrb.gmra.mxu2 %vm443_vm3, %v440_v48  ;;  %698 = vmatmul.msk.f32.vlgmr.msrb.gmra.mxu3 %vm443_vm3, %v440_v48 }
 0x166   : > { %v565_v56 = vpop.f32.mrf.mxu0  ;;  %v588_v1 = vpop.f32.mrf.mxu1 }
 0x16e   : > { %v467_v57 = vpop.f32.mrf.mxu2  ;;  %v490_v58 = vpop.f32.mrf.mxu3 }
 0x16f   : > { %v566_v59 = vadd.f32 %v565_v56, %v490_v58 }
 0x171   : > { %v595_v61 = vmul.f32 %v566_v59, %v1004_v49 }
 0x173   : > { %v609_v62 = vmul.f32 %v603_v60, %v595_v61 }
 0x175   : > { %615 = vst [vmem:[%s1092_s6 + $0x8] sm:$0xff] %v609_v62 }
 0x176   : > { %v470_v63 = vpop.f32.mrf.mxu2  ;;  %v493_v0 = vpop.f32.mrf.mxu3 }
 0x17e   : > { %v513_v2 = vpop.f32.mrf.mxu2  ;;  %v542_v3 = vpop.f32.mrf.mxu3 }
 0x17f   : > { %v589_v4 = vadd.f32 %v588_v1, %v513_v2  ;;  %v543_v49 = vadd.f32 %v542_v3, %v467_v57 }
 0x181   : > { %v596_v7 = vmul.f32 %v589_v4, %v1010_v50  ;;  %v594_v8 = vmul.f32 %v543_v49, %v996_v47 }
 0x183   : > { %v610_v9 = vmul.f32 %v604_v5, %v596_v7  ;;  %v608_v10 = vmul.f32 %v602_v6, %v594_v8 }
 0x185   : > { %616 = vst [vmem:[%s1092_s6 + $0x10] sm:$0xff] %v610_v9 }
 0x186   : > { %614 = vst [vmem:[%s1092_s6] sm:$0xff] %v608_v10  ;;  %v516_v11 = vpop.f32.mrf.mxu2  ;;  %v545_v12 = vpop.f32.mrf.mxu3 }
 0x187   : > { %v546_v13 = vadd.f32 %v545_v12, %v470_v63 }
 0x189   : > { %v597_v14 = vmul.f32 %v546_v13, %v1021_v52 }
 0x18b   : > { %v611_v15 = vmul.f32 %v602_v6, %v597_v14 }
 0x18d   : > { %617 = vst [vmem:[%s1092_s6 + $0x18] sm:$0xff] %v611_v15 }
 0x18e   : > { %v568_v16 = vpop.f32.mrf.mxu2  ;;  %v591_v17 = vpop.f32.mrf.mxu3 }
 0x18f   : > { %v569_v18 = vadd.f32 %v568_v16, %v493_v0  ;;  %v592_v19 = vadd.f32 %v591_v17, %v516_v11 }
 0x191   : > { %v598_v50 = vmul.f32 %v569_v18, %v1026_v53  ;;  %v599_v47 = vmul.f32 %v592_v19, %v1032_v54 }
 0x193   : > { %v612_v20 = vmul.f32 %v603_v60, %v598_v50  ;;  %v613_v21 = vmul.f32 %v604_v5, %v599_v47 }
 0x195   : > { %618 = vst [vmem:[%s1092_s6 + $0x20] sm:$0xff] %v612_v20 }
 0x196   : > { %619 = vst [vmem:[%s1092_s6 + $0x28] sm:$0xff] %v613_v21 }
 0x197 PF: > { %s14_s15 = sadd.s32 1, %s722_s15  }
 0x198   : > { %p11_p4 = scmp.ge.s32.totalorder %s14_s15, 6  }
 0x19a   :  { %13 = sbr.rel (!%p11_p4) target bundleno = 1 (0x1), region = 66 }

// kernel: biasfree_layernorm.1
= control target key start
LH: loop header
LB: loop body
LE: loop exit
PB: predicated region body
PF: predicated region fallthrough
CT: control target
= control target key end

     0   :  { %s699_s9 = smov 0   ;;  %s1099_s0 = inlined_call_operand.vmem [shape: f32[512,48], index: 0, kind: input, shape index: {}]   ;;  %s1100_s1 = inlined_call_operand.vmem [shape: f32[1,48], index: 1, kind: input, shape index: {}]   ;;  %s1101_s2 = inlined_call_operand.vmem [shape: f32[512,48], index: 2, kind: output, shape index: {}]  }
   0x1 LB: > { %s624_s10 = sadd.s32 4294967295, %s682_s9   ;;  %p628_p0 = scmp.ge.s32.totalorder %s682_s9, 1  ;;  %s682_s9 = sphi %s699_s9, %s12_s9  }
   0x2   : > { %p113_p1 = scmp.lt.s32.totalorder %s682_s9, 5 }
   0x4   : > { %p114_p2 = pnand %p628_p0, %p113_p1 }
   0x5   : > { %s629_s11 = sshll.u32 (!%p114_p2), %s624_s10, 4 }
   0x6   : > { %117 = sbr.rel (%p114_p2) target bundleno = 247 (0xf7), region = 28  ;;  %p136_p3 = scmp.lt.s32.totalorder (!%p114_p2), %s629_s11, 63 }
   0xb   : > { %s1103_s11 = smov (!%p136_p3, %s629_s11), 63  ;;  %vm163_vm0 = vcmask 392192  }
   0xc   : > { %s630_s12 = sshll.u32 %s1103_s11, 3 }
   0xd   : > { %s715_s15 = scalar_lea.vmem %s1099_s0, %s630_s12  ;;  %s920_s20 = scalar_lea.vmem %s1101_s2, %s630_s12 }
   0xe   : > { %v718_v0 = vld [vmem:[%s715_s15 + $0x20] sm:$0xff]  ;;  %v721_v1 = vld [vmem:[%s715_s15 + $0x10] sm:$0xff]  ;;  %v733_v6 = vld [vmem:[%s715_s15 + $0x28] sm:$0xff] }
   0xf   : > { %v724_v2 = vld [vmem:[%s715_s15] sm:$0xff]  ;;  %v176_v3 = vsel %vm163_vm0, %v718_v0, 0.0  ;;  %v170_v4 = vsel %vm163_vm0, %v721_v1, 0.0  ;;  %v736_v7 = vld [vmem:[%s715_s15 + $0x18] sm:$0xff]  ;;  %v739_v8 = vld [vmem:[%s715_s15 + $0x8] sm:$0xff]  ;;  %v179_v9 = vsel %vm163_vm0, %v733_v6, 0.0  ;;  %v232_v36 = vmul.f32 %v718_v0, %v718_v0 }
  0x10   : > { %v164_v5 = vsel %vm163_vm0, %v724_v2, 0.0  ;;  %177 = vadd.xlane.f32.xlu2 %v176_v3  ;;  %171 = vadd.xlane.f32.xlu1 %v170_v4  ;;  %v173_v10 = vsel %vm163_vm0, %v736_v7, 0.0  ;;  %v167_v11 = vsel %vm163_vm0, %v739_v8, 0.0  ;;  %v748_v12 = vld [vmem:[%s715_s15 + $0x40] sm:$0xff]  ;;  %v751_v13 = vld [vmem:[%s715_s15 + $0x38] sm:$0xff]  ;;  %v754_v14 = vld [vmem:[%s715_s15 + $0x30] sm:$0xff]  ;;  %v229_v30 = vmul.f32 %v739_v8, %v739_v8 }
  0x11   : > { %165 = vadd.xlane.f32.xlu0 %v164_v5  ;;  %v188_v15 = vsel %vm163_vm0, %v748_v12, 0.0  ;;  %v185_v16 = vsel %vm163_vm0, %v751_v13, 0.0  ;;  %v182_v17 = vsel %vm163_vm0, %v754_v14, 0.0  ;;  %v763_v18 = vld [vmem:[%s715_s15 + $0x58] sm:$0xff]  ;;  %v766_v19 = vld [vmem:[%s715_s15 + $0x50] sm:$0xff]  ;;  %v769_v20 = vld [vmem:[%s715_s15 + $0x48] sm:$0xff]  ;;  %v228_v31 = vmul.f32 %v724_v2, %v724_v2 }
  0x12   : > { %v197_v21 = vsel %vm163_vm0, %v763_v18, 0.0  ;;  %v194_v22 = vsel %vm163_vm0, %v766_v19, 0.0  ;;  %v191_v23 = vsel %vm163_vm0, %v769_v20, 0.0  ;;  %v778_v24 = vld [vmem:[%s715_s15 + $0x70] sm:$0xff]  ;;  %v781_v25 = vld [vmem:[%s715_s15 + $0x68] sm:$0xff]  ;;  %v784_v26 = vld [vmem:[%s715_s15 + $0x60] sm:$0xff]  ;;  %v231_v37 = vmul.f32 %v736_v7, %v736_v7 }
  0x13   : > { %v206_v27 = vsel %vm163_vm0, %v778_v24, 0.0  ;;  %v203_v28 = vsel %vm163_vm0, %v781_v25, 0.0  ;;  %v200_v29 = vsel %vm163_vm0, %v784_v26, 0.0  ;;  %v797_v32 = vld [vmem:[%s715_s15 + $0x78] sm:$0xff]  ;;  %v247_v33 = vsel %vm163_vm0, %v229_v30, 0.0 }
  0x14   : > { %v244_v34 = vsel %vm163_vm0, %v228_v31, 0.0  ;;  %v209_v35 = vsel %vm163_vm0, %v797_v32, 0.0  ;;  %v230_v38 = vmul.f32 %v721_v1, %v721_v1  ;;  %v256_v39 = vsel %vm163_vm0, %v232_v36, 0.0 }
  0x15   : > { %v253_v40 = vsel %vm163_vm0, %v231_v37, 0.0  ;;  %v235_v42 = vmul.f32 %v751_v13, %v751_v13  ;;  %v234_v43 = vmul.f32 %v754_v14, %v754_v14  ;;  %v233_v44 = vmul.f32 %v733_v6, %v733_v6 }
  0x16   : > { %v250_v41 = vsel %vm163_vm0, %v230_v38, 0.0  ;;  %v238_v48 = vmul.f32 %v766_v19, %v766_v19  ;;  %v237_v49 = vmul.f32 %v769_v20, %v769_v20  ;;  %v236_v50 = vmul.f32 %v748_v12, %v748_v12 }
  0x17   : > { %v265_v45 = vsel %vm163_vm0, %v235_v42, 0.0  ;;  %v262_v46 = vsel %vm163_vm0, %v234_v43, 0.0  ;;  %v259_v47 = vsel %vm163_vm0, %v233_v44, 0.0  ;;  %v241_v54 = vmul.f32 %v781_v25, %v781_v25 }
  0x18   : > { %180 = vadd.xlane.f32.xlu2 %v179_v9  ;;  %174 = vadd.xlane.f32.xlu1 %v173_v10  ;;  %v274_v51 = vsel %vm163_vm0, %v238_v48, 0.0  ;;  %v271_v52 = vsel %vm163_vm0, %v237_v49, 0.0  ;;  %v268_v53 = vsel %vm163_vm0, %v236_v50, 0.0  ;;  %v240_v55 = vmul.f32 %v784_v26, %v784_v26 }
  0x19   : > { %168 = vadd.xlane.f32.xlu0 %v167_v11  ;;  %v239_v56 = vmul.f32 %v763_v18, %v763_v18  ;;  %v283_v57 = vsel %vm163_vm0, %v241_v54, 0.0  ;;  %v243_v60 = vmul.f32 %v797_v32, %v797_v32  ;;  %v242_v61 = vmul.f32 %v778_v24, %v778_v24 }
  0x1a   : > { %v280_v58 = vsel %vm163_vm0, %v240_v55, 0.0 }
  0x1b   : > { %v277_v59 = vsel %vm163_vm0, %v239_v56, 0.0  ;;  %v289_v62 = vsel %vm163_vm0, %v243_v60, 0.0  ;;  %v286_v63 = vsel %vm163_vm0, %v242_v61, 0.0 }
  0x20   : > { %189 = vadd.xlane.f32.xlu2 %v188_v15  ;;  %186 = vadd.xlane.f32.xlu1 %v185_v16 }
  0x21   : > { %183 = vadd.xlane.f32.xlu0 %v182_v17 }
  0x28   : > { %198 = vadd.xlane.f32.xlu2 %v197_v21  ;;  %195 = vadd.xlane.f32.xlu1 %v194_v22 }
  0x29   : > { %192 = vadd.xlane.f32.xlu0 %v191_v23 }
  0x30   : > { %207 = vadd.xlane.f32.xlu2 %v206_v27  ;;  %204 = vadd.xlane.f32.xlu1 %v203_v28 }
  0x31   : > { %201 = vadd.xlane.f32.xlu0 %v200_v29 }
  0x38   : > { %248 = vadd.xlane.f32.xlu2 %v247_v33  ;;  %245 = vadd.xlane.f32.xlu1 %v244_v34 }
  0x39   : > { %210 = vadd.xlane.f32.xlu0 %v209_v35 }
  0x40   : > { %257 = vadd.xlane.f32.xlu2 %v256_v39  ;;  %254 = vadd.xlane.f32.xlu1 %v253_v40 }
  0x41   : > { %251 = vadd.xlane.f32.xlu0 %v250_v41 }
  0x48   : > { %266 = vadd.xlane.f32.xlu2 %v265_v45  ;;  %263 = vadd.xlane.f32.xlu1 %v262_v46 }
  0x49   : > { %260 = vadd.xlane.f32.xlu0 %v259_v47 }
  0x50   : > { %275 = vadd.xlane.f32.xlu2 %v274_v51  ;;  %272 = vadd.xlane.f32.xlu1 %v271_v52 }
  0x51   : > { %269 = vadd.xlane.f32.xlu0 %v268_v53 }
  0x58   : > { %284 = vadd.xlane.f32.xlu2 %v283_v57  ;;  %281 = vadd.xlane.f32.xlu1 %v280_v58 }
  0x59   : > { %278 = vadd.xlane.f32.xlu0 %v277_v59 }
  0x60   : > { %290 = vadd.xlane.f32.xlu1 %v289_v62 }
  0x61   : > { %287 = vadd.xlane.f32.xlu0 %v286_v63 }
  0x83   : > { %v178_v3 = vpop.xlane.xlu2 %177  ;;  %v172_v4 = vpop.xlane.xlu1 %171 }
  0x84   : > { %v166_v5 = vpop.xlane.xlu0 %165  ;;  %v216_v42 = vmul.f32 0.020833334, %v178_v3  ;;  %v214_v46 = vmul.f32 0.020833334, %v172_v4 }
  0x85   : > { %v212_v30 = vmul.f32 0.020833334, %v166_v5 }
  0x86   : > { %v312_v47 = vmul.f32 %v216_v42, %v216_v42  ;;  %v310_v56 = vmul.f32 %v214_v46, %v214_v46 }
  0x87   : > { %v308_v35 = vmul.f32 %v212_v30, %v212_v30 }
  0x8b   : > { %v181_v9 = vpop.xlane.xlu2 %180  ;;  %v175_v10 = vpop.xlane.xlu1 %174 }
  0x8c   : > { %v169_v11 = vpop.xlane.xlu0 %168  ;;  %v215_v43 = vmul.f32 0.020833334, %v175_v10  ;;  %v217_v48 = vmul.f32 0.020833334, %v181_v9 }
  0x8d   : > { %v213_v31 = vmul.f32 0.020833334, %v169_v11 }
  0x8e   : > { %v311_v51 = vmul.f32 %v215_v43, %v215_v43  ;;  %v313_v5 = vmul.f32 %v217_v48, %v217_v48 }
  0x8f   : > { %v309_v36 = vmul.f32 %v213_v31, %v213_v31 }
  0x93   : > { %v190_v15 = vpop.xlane.xlu2 %189  ;;  %v187_v16 = vpop.xlane.xlu1 %186 }
  0x94   : > { %v184_v17 = vpop.xlane.xlu0 %183  ;;  %v220_v52 = vmul.f32 0.020833334, %v190_v15  ;;  %v219_v57 = vmul.f32 0.020833334, %v187_v16 }
  0x95   : > { %v218_v59 = vmul.f32 0.020833334, %v184_v17 }
  0x96   : > { %v857_v9 = vmul.f32 %v220_v52, %v220_v52  ;;  %v315_v30 = vmul.f32 %v219_v57, %v219_v57 }
  0x97   : > { %v314_v17 = vmul.f32 %v218_v59, %v218_v59 }
  0x9b   : > { %v199_v21 = vpop.xlane.xlu2 %198  ;;  %v196_v22 = vpop.xlane.xlu1 %195 }
  0x9c   : > { %v193_v23 = vpop.xlane.xlu0 %192  ;;  %v223_v60 = vmul.f32 0.020833334, %v199_v21  ;;  %v222_v63 = vmul.f32 0.020833334, %v196_v22 }
  0x9d   : > { %v221_v31 = vmul.f32 0.020833334, %v193_v23 }
  0x9e   : > { %v866_v21 = vmul.f32 %v223_v60, %v223_v60 }
  0x9f   : > { %v874_v43 = vmul.f32 %v221_v31, %v221_v31 }
  0xa3   : > { %v845_v27 = vpop.xlane.xlu2 %207  ;;  %v205_v28 = vpop.xlane.xlu1 %204 }
  0xa4   : > { %v847_v29 = vpop.xlane.xlu0 %201  ;;  %v877_v46 = vmul.f32 0.020833334, %v845_v27 }
  0xab   : > { %v249_v33 = vpop.xlane.xlu2 %248  ;;  %v246_v34 = vpop.xlane.xlu1 %245 }
  0xac   : > { %v293_v37 = vmul.f32 0.020833334, %v249_v33  ;;  %v292_v38 = vmul.f32 0.020833334, %v246_v34  ;;  %v849_v39 = vpop.xlane.xlu0 %210  ;;  %v870_v34 = vmul.f32 %v222_v63, %v222_v63 }
  0xae   : > { %v325_v40 = vsub.f32 %v293_v37, %v309_v36  ;;  %v324_v41 = vsub.f32 %v292_v38, %v308_v35  ;;  %v225_v35 = vmul.f32 0.020833334, %v205_v28  ;;  %v224_v28 = vmul.f32 0.020833334, %v847_v29 }
  0xb0   : > { %v851_v44 = vadd.f32 1e-05, %v325_v40  ;;  %v853_v45 = vadd.f32 1e-05, %v324_v41  ;;  %v880_v52 = vmul.f32 %v225_v35, %v225_v35  ;;  %v906_v63 = vmul.f32 %v224_v28, %v224_v28 }
  0xb2   : > { %644 = vrsqrt.f32 %v851_v44  ;;  %vm372_vm2 = vweird.f32 %v851_v44  ;;  %vm362_vm4 = vweird.f32 %v853_v45 }
  0xb3   : > { %646 = vrsqrt.f32 %v853_v45  ;;  %v258_v49 = vpop.xlane.xlu2 %257  ;;  %v255_v50 = vpop.xlane.xlu1 %254 }
  0xb4   : > { %v296_v53 = vmul.f32 0.020833334, %v258_v49  ;;  %v295_v54 = vmul.f32 0.020833334, %v255_v50  ;;  %v252_v55 = vpop.xlane.xlu0 %251 }
  0xb5   : > { %v294_v58 = vmul.f32 0.020833334, %v252_v55 }
  0xb6   : > { %v328_v61 = vsub.f32 %v296_v53, %v312_v47  ;;  %v327_v62 = vsub.f32 %v295_v54, %v311_v51 }
  0xb7   : > { %v326_v3 = vsub.f32 %v294_v58, %v310_v56 }
  0xb8   : > { %v645_v4 = vpop.eup %644  ;;  %v859_v10 = vadd.f32 1e-05, %v328_v61  ;;  %v861_v11 = vadd.f32 1e-05, %v327_v62 }
  0xb9   : > { %v647_v15 = vpop.eup %646  ;;  %v367_v16 = vmul.f32 %v645_v4, %v851_v44  ;;  %v864_v33 = vadd.f32 1e-05, %v326_v3  ;;  %vm373_vm1 = vweird.f32 %v645_v4  ;;  %v899_v44 = vld [vmem:[%s1100_s1] ss:$0 sm:$0xff] }
  0xba   : > { %v357_v22 = vmul.f32 %v647_v15, %v853_v45  ;;  %648 = vrsqrt.f32 %v859_v10  ;;  %vm363_vm3 = vweird.f32 %v647_v15  ;;  %vm374_vm5 = vmor %vm372_vm2, %vm373_vm1  ;;  %vm402_vm7 = vweird.f32 %v859_v10 }
  0xbb   : > { %v368_v36 = vmul.f32 %v645_v4, %v367_v16  ;;  %650 = vrsqrt.f32 %v861_v11  ;;  %v267_v37 = vpop.xlane.xlu2 %266  ;;  %v264_v38 = vpop.xlane.xlu1 %263  ;;  %vm364_vm6 = vmor %vm362_vm4, %vm363_vm3  ;;  %vm392_vm8 = vweird.f32 %v861_v11  ;;  %vm382_vm13 = vweird.f32 %v864_v33 }
  0xbc   : > { %v358_v23 = vmul.f32 %v647_v15, %v357_v22  ;;  %652 = vrsqrt.f32 %v864_v33  ;;  %v299_v40 = vmul.f32 0.020833334, %v267_v37  ;;  %v298_v41 = vmul.f32 0.020833334, %v264_v38  ;;  %v261_v42 = vpop.xlane.xlu0 %260 }
  0xbd   : > { %v369_v47 = vmul.f32 0.5, %v368_v36  ;;  %v297_v48 = vmul.f32 0.020833334, %v261_v42 }
  0xbe   : > { %v359_v49 = vmul.f32 0.5, %v358_v23  ;;  %v331_v50 = vsub.f32 %v299_v40, %v315_v30  ;;  %v330_v51 = vsub.f32 %v298_v41, %v314_v17 }
  0xbf   : > { %v370_v53 = vsub.f32 1.5, %v369_v47  ;;  %v329_v54 = vsub.f32 %v297_v48, %v313_v5 }
  0xc0   : > { %v882_v55 = vpop.eup %648  ;;  %v360_v56 = vsub.f32 1.5, %v359_v49  ;;  %v885_v27 = vadd.f32 1e-05, %v331_v50  ;;  %v892_v59 = vadd.f32 1e-05, %v330_v51 }
  0xc1   : > { %v887_v57 = vpop.eup %650  ;;  %v371_v58 = vmul.f32 %v645_v4, %v370_v53  ;;  %v397_v29 = vmul.f32 %v882_v55, %v859_v10  ;;  %v904_v45 = vadd.f32 1e-05, %v329_v54  ;;  %vm403_vm9 = vweird.f32 %v882_v55 }
  0xc2   : > { %v894_v60 = vpop.eup %652  ;;  %v361_v61 = vmul.f32 %v647_v15, %v360_v56  ;;  %v387_v62 = vmul.f32 %v887_v57, %v861_v11  ;;  %654 = vrsqrt.f32 %v885_v27  ;;  %vm393_vm10 = vweird.f32 %v887_v57  ;;  %vm404_vm12 = vmor %vm402_vm7, %vm403_vm9 }
  0xc3   : > { %v375_v3 = vsel %vm374_vm5, %v645_v4, %v371_v58  ;;  %v398_v5 = vmul.f32 %v882_v55, %v397_v29  ;;  %v377_v30 = vmul.f32 %v894_v60, %v864_v33  ;;  %v273_v31 = vpop.xlane.xlu1 %272  ;;  %656 = vrsqrt.f32 %v892_v59  ;;  %vm394_vm15 = vmor %vm392_vm8, %vm393_vm10 }
  0xc4   : > { %v517_v16 = vmul.f32 %v375_v3, %v739_v8  ;;  %v365_v17 = vsel %vm364_vm6, %v647_v15, %v361_v61  ;;  %v388_v22 = vmul.f32 %v887_v57, %v387_v62  ;;  %v270_v35 = vpop.xlane.xlu0 %269  ;;  %v276_v8 = vpop.xlane.xlu2 %275  ;;  %658 = vrsqrt.f32 %v904_v45 }
  0xc5   : > { %v516_v4 = vmul.f32 %v365_v17, %v724_v2  ;;  %v399_v36 = vmul.f32 0.5, %v398_v5  ;;  %v378_v37 = vmul.f32 %v894_v60, %v377_v30  ;;  %v302_v47 = vmul.f32 0.020833334, %v276_v8 }
  0xc6   : > { %v537_v15 = vmul.f32 %v899_v44, %v517_v16  ;;  %v389_v38 = vmul.f32 0.5, %v388_v22  ;;  %v301_v48 = vmul.f32 0.020833334, %v273_v31  ;;  %vm383_vm11 = vweird.f32 %v894_v60 }
  0xc7   : > { %v536_v23 = vmul.f32 %v899_v44, %v516_v4  ;;  %v400_v40 = vsub.f32 1.5, %v399_v36  ;;  %v379_v2 = vmul.f32 0.5, %v378_v37  ;;  %vm432_vm14 = vweird.f32 %v885_v27  ;;  %vm384_vm1 = vmor %vm382_vm13, %vm383_vm11 }
  0xc8   : > { %v930_v41 = vpop.eup %654  ;;  %553 = vst.msk [vmem:[%s920_s20 + $0x8] sm:$0xff] %vm163_vm0, %v537_v15  ;;  %v390_v42 = vsub.f32 1.5, %v389_v38  ;;  %v334_v53 = vsub.f32 %v302_v47, %v870_v34  ;;  %v333_v29 = vsub.f32 %v301_v48, %v874_v43  ;;  %vm422_vm2 = vweird.f32 %v892_v59 }
  0xc9   : > { %552 = vst.msk [vmem:[%s920_s20] sm:$0xff] %vm163_vm0, %v536_v23  ;;  %v401_v28 = vmul.f32 %v882_v55, %v400_v40  ;;  %v380_v49 = vsub.f32 1.5, %v379_v2  ;;  %v427_v50 = vmul.f32 %v930_v41, %v885_v27  ;;  %v947_v54 = vpop.eup %656  ;;  %vm433_vm3 = vweird.f32 %v930_v41 }
  0xca   : > { %v391_v51 = vmul.f32 %v887_v57, %v390_v42  ;;  %v957_v61 = vpop.eup %658  ;;  %v417_v11 = vmul.f32 %v947_v54, %v892_v59  ;;  %v981_v36 = vadd.f32 1e-05, %v333_v29  ;;  %vm423_vm4 = vweird.f32 %v947_v54  ;;  %vm434_vm5 = vmor %vm432_vm14, %vm433_vm3 }
  0xcb   : > { %v405_v56 = vsel %vm404_vm12, %v882_v55, %v401_v28  ;;  %v381_v10 = vmul.f32 %v894_v60, %v380_v49  ;;  %v428_v58 = vmul.f32 %v930_v41, %v427_v50  ;;  %v282_v33 = vpop.xlane.xlu1 %281  ;;  %v300_v55 = vmul.f32 0.020833334, %v270_v35  ;;  %vm424_vm8 = vmor %vm422_vm2, %vm423_vm4 }
  0xcc   : > { %v520_v34 = vmul.f32 %v405_v56, %v718_v0  ;;  %v395_v62 = vsel %vm394_vm15, %v887_v57, %v391_v51  ;;  %v279_v3 = vpop.xlane.xlu0 %278  ;;  %v407_v0 = vmul.f32 %v957_v61, %v904_v45  ;;  %v418_v16 = vmul.f32 %v947_v54, %v417_v11  ;;  %v285_v37 = vpop.xlane.xlu2 %284 }
  0xcd   : > { %v519_v43 = vmul.f32 %v395_v62, %v736_v7  ;;  %v385_v5 = vsel %vm384_vm1, %v894_v60, %v381_v10  ;;  %v429_v30 = vmul.f32 0.5, %v428_v58  ;;  %v976_v60 = vadd.f32 1e-05, %v334_v53 }
  0xce   : > { %v540_v57 = vmul.f32 %v899_v44, %v520_v34  ;;  %v518_v31 = vmul.f32 %v385_v5, %v721_v1  ;;  %v408_v7 = vmul.f32 %v957_v61, %v407_v0  ;;  %v419_v4 = vmul.f32 0.5, %v418_v16 }
  0xcf   : > { %v539_v17 = vmul.f32 %v899_v44, %v519_v43  ;;  %v430_v22 = vsub.f32 1.5, %v429_v30  ;;  %v332_v1 = vsub.f32 %v300_v55, %v857_v9  ;;  %660 = vrsqrt.f32 %v976_v60 }
  0xd0   : > { %556 = vst.msk [vmem:[%s920_s20 + $0x20] sm:$0xff] %vm163_vm0, %v540_v57  ;;  %v538_v35 = vmul.f32 %v899_v44, %v518_v31  ;;  %v409_v15 = vmul.f32 0.5, %v408_v7  ;;  %v420_v38 = vsub.f32 1.5, %v419_v4  ;;  %vm413_vm6 = vweird.f32 %v957_v61 }
  0xd1   : > { %555 = vst.msk [vmem:[%s920_s20 + $0x18] sm:$0xff] %vm163_vm0, %v539_v17  ;;  %v431_v8 = vmul.f32 %v930_v41, %v430_v22  ;;  %662 = vrsqrt.f32 %v981_v36  ;;  %v997_v9 = vadd.f32 1e-05, %v332_v1  ;;  %v305_v2 = vmul.f32 0.020833334, %v285_v37 }
  0xd2   : > { %554 = vst.msk [vmem:[%s920_s20 + $0x10] sm:$0xff] %vm163_vm0, %v538_v35  ;;  %v410_v40 = vsub.f32 1.5, %v409_v15  ;;  %v304_v42 = vmul.f32 0.020833334, %v282_v33  ;;  %v421_v28 = vmul.f32 %v947_v54, %v420_v38  ;;  %vm412_vm7 = vweird.f32 %v904_v45 }
  0xd3   : > { %v435_v23 = vsel %vm434_vm5, %v930_v41, %v431_v8  ;;  %v291_v47 = vpop.xlane.xlu1 %290  ;;  %664 = vrsqrt.f32 %v997_v9  ;;  %v337_v41 = vsub.f32 %v305_v2, %v880_v52  ;;  %v303_v50 = vmul.f32 0.020833334, %v279_v3  ;;  %vm414_vm9 = vmor %vm412_vm7, %vm413_vm6 }
  0xd4   : > { %v523_v48 = vmul.f32 %v435_v23, %v751_v13  ;;  %v411_v27 = vmul.f32 %v957_v61, %v410_v40  ;;  %v336_v49 = vsub.f32 %v304_v42, %v906_v63  ;;  %v288_v13 = vpop.xlane.xlu0 %287  ;;  %v227_v51 = vmul.f32 0.020833334, %v849_v39 }
  0xd5   : > { %v425_v53 = vsel %vm424_vm8, %v947_v54, %v421_v28  ;;  %v307_v59 = vmul.f32 0.020833334, %v291_v47  ;;  %v661_v56 = vpop.eup %660  ;;  %v1018_v52 = vadd.f32 1e-05, %v337_v41  ;;  %v335_v33 = vsub.f32 %v303_v50, %v866_v21 }
  0xd6   : > { %v543_v45 = vmul.f32 %v899_v44, %v523_v48  ;;  %v522_v10 = vmul.f32 %v425_v53, %v754_v14  ;;  %v415_v58 = vsel %vm414_vm9, %v957_v61, %v411_v27  ;;  %v1020_v63 = vadd.f32 1e-05, %v336_v49 }
  0xd7   : > { %v663_v29 = vpop.eup %662  ;;  %v521_v39 = vmul.f32 %v415_v58, %v733_v6  ;;  %v457_v54 = vmul.f32 %v661_v56, %v976_v60  ;;  %v306_v34 = vmul.f32 0.020833334, %v288_v13  ;;  %v322_v14 = vmul.f32 %v877_v46, %v877_v46 }
  0xd8   : > { %559 = vst.msk [vmem:[%s920_s20 + $0x38] sm:$0xff] %vm163_vm0, %v543_v45  ;;  %v542_v61 = vmul.f32 %v899_v44, %v522_v10  ;;  %v447_v62 = vmul.f32 %v663_v29, %v981_v36  ;;  %666 = vrsqrt.f32 %v1018_v52  ;;  %v323_v55 = vmul.f32 %v227_v51, %v227_v51 }
  0xd9   : > { %v665_v11 = vpop.eup %664  ;;  %v541_v3 = vmul.f32 %v899_v44, %v521_v39  ;;  %v458_v6 = vmul.f32 %v661_v56, %v457_v54  ;;  %668 = vrsqrt.f32 %v1020_v63  ;;  %v1039_v5 = vadd.f32 1e-05, %v335_v33 }
  0xda   : > { %558 = vst.msk [vmem:[%s920_s20 + $0x30] sm:$0xff] %vm163_vm0, %v542_v61  ;;  %v448_v21 = vmul.f32 %v663_v29, %v447_v62  ;;  %v437_v43 = vmul.f32 %v665_v11, %v997_v9  ;;  %v339_v30 = vsub.f32 %v307_v59, %v323_v55  ;;  %v338_v0 = vsub.f32 %v306_v34, %v322_v14 }
  0xdb   : > { %557 = vst.msk [vmem:[%s920_s20 + $0x28] sm:$0xff] %vm163_vm0, %v541_v3  ;;  %v459_v46 = vmul.f32 0.5, %v458_v6  ;;  %vm462_vm10 = vweird.f32 %v976_v60  ;;  %vm463_vm11 = vweird.f32 %v661_v56  ;;  %670 = vrsqrt.f32 %v1039_v5 }
  0xdc   : > { %v449_v57 = vmul.f32 0.5, %v448_v21  ;;  %v438_v31 = vmul.f32 %v665_v11, %v437_v43  ;;  %v1043_v17 = vadd.f32 1e-05, %v339_v30  ;;  %vm453_vm12 = vweird.f32 %v663_v29  ;;  %vm464_vm14 = vmor %vm462_vm10, %vm463_vm11 }
  0xdd   : > { %v460_v16 = vsub.f32 1.5, %v459_v46  ;;  %v1045_v4 = vadd.f32 1e-05, %v338_v0  ;;  %vm452_vm13 = vweird.f32 %v981_v36  ;;  %vm443_vm15 = vweird.f32 %v665_v11 }
  0xde   : > { %v667_v22 = vpop.eup %666  ;;  %v450_v7 = vsub.f32 1.5, %v449_v57  ;;  %v439_v35 = vmul.f32 0.5, %v438_v31  ;;  %672 = vrsqrt.f32 %v1043_v17  ;;  %vm454_vm1 = vmor %vm452_vm13, %vm453_vm12  ;;  %vm442_vm2 = vweird.f32 %v997_v9 }
  0xdf   : > { %v669_v1 = vpop.eup %668  ;;  %v461_v37 = vmul.f32 %v661_v56, %v460_v16  ;;  %v487_v8 = vmul.f32 %v667_v22, %v1018_v52  ;;  %674 = vrsqrt.f32 %v1045_v4  ;;  %vm444_vm3 = vmor %vm442_vm2, %vm443_vm15  ;;  %vm493_vm4 = vweird.f32 %v667_v22 }
  0xe0   : > { %v451_v15 = vmul.f32 %v663_v29, %v450_v7  ;;  %v440_v38 = vsub.f32 1.5, %v439_v35  ;;  %v477_v23 = vmul.f32 %v669_v1, %v1020_v63  ;;  %vm483_vm5 = vweird.f32 %v669_v1 }
  0xe1   : > { %v465_v40 = vsel %vm464_vm14, %v661_v56, %v461_v37  ;;  %v488_v2 = vmul.f32 %v667_v22, %v487_v8  ;;  %v671_v60 = vpop.eup %670  ;;  %vm492_vm6 = vweird.f32 %v1018_v52  ;;  %vm482_vm7 = vweird.f32 %v1020_v63 }
  0xe2   : > { %v526_v36 = vmul.f32 %v465_v40, %v766_v19  ;;  %v455_v42 = vsel %vm454_vm1, %v663_v29, %v451_v15  ;;  %v441_v47 = vmul.f32 %v665_v11, %v440_v38  ;;  %v478_v48 = vmul.f32 %v669_v1, %v477_v23  ;;  %vm494_vm8 = vmor %vm492_vm6, %vm493_vm4 }
  0xe3   : > { %v525_v28 = vmul.f32 %v455_v42, %v769_v20  ;;  %v489_v27 = vmul.f32 0.5, %v488_v2  ;;  %v467_v9 = vmul.f32 %v671_v60, %v1039_v5  ;;  %vm484_vm9 = vmor %vm482_vm7, %vm483_vm5  ;;  %vm473_vm10 = vweird.f32 %v671_v60 }
  0xe4   : > { %v546_v41 = vmul.f32 %v899_v44, %v526_v36  ;;  %v445_v49 = vsel %vm444_vm3, %v665_v11, %v441_v47  ;;  %v479_v50 = vmul.f32 0.5, %v478_v48  ;;  %v673_v13 = vpop.eup %672  ;;  %vm472_vm11 = vweird.f32 %v1039_v5 }
  0xe5   : > { %v545_v51 = vmul.f32 %v899_v44, %v525_v28  ;;  %v524_v19 = vmul.f32 %v445_v49, %v748_v12  ;;  %v490_v45 = vsub.f32 1.5, %v489_v27  ;;  %v468_v53 = vmul.f32 %v671_v60, %v467_v9  ;;  %v675_v56 = vpop.eup %674  ;;  %vm474_vm13 = vmor %vm472_vm11, %vm473_vm10 }
  0xe6   : > { %562 = vst.msk [vmem:[%s920_s20 + $0x50] sm:$0xff] %vm163_vm0, %v546_v41  ;;  %v480_v20 = vsub.f32 1.5, %v479_v50  ;;  %v507_v59 = vmul.f32 %v673_v13, %v1043_v17  ;;  %v497_v54 = vmul.f32 %v675_v56, %v1045_v4  ;;  %vm513_vm12 = vweird.f32 %v673_v13 }
  0xe7   : > { %561 = vst.msk [vmem:[%s920_s20 + $0x48] sm:$0xff] %vm163_vm0, %v545_v51  ;;  %v544_v10 = vmul.f32 %v899_v44, %v524_v19  ;;  %v491_v58 = vmul.f32 %v667_v22, %v490_v45  ;;  %v469_v29 = vmul.f32 0.5, %v468_v53  ;;  %vm512_vm14 = vweird.f32 %v1043_v17 }
  0xe8   : > { %v481_v12 = vmul.f32 %v669_v1, %v480_v20  ;;  %v508_v39 = vmul.f32 %v673_v13, %v507_v59  ;;  %v498_v62 = vmul.f32 %v675_v56, %v497_v54  ;;  %vm514_vm15 = vmor %vm512_vm14, %vm513_vm12  ;;  %vm503_vm1 = vweird.f32 %v675_v56 }
  0xe9   : > { %560 = vst.msk [vmem:[%s920_s20 + $0x40] sm:$0xff] %vm163_vm0, %v544_v10  ;;  %v495_v33 = vsel %vm494_vm8, %v667_v22, %v491_v58  ;;  %v470_v61 = vsub.f32 1.5, %v469_v29  ;;  %vm502_vm2 = vweird.f32 %v1045_v4 }
  0xea   : > { %v529_v34 = vmul.f32 %v495_v33, %v781_v25  ;;  %v485_v14 = vsel %vm484_vm9, %v669_v1, %v481_v12  ;;  %v509_v52 = vmul.f32 0.5, %v508_v39  ;;  %v499_v21 = vmul.f32 0.5, %v498_v62  ;;  %vm504_vm3 = vmor %vm502_vm2, %vm503_vm1 }
  0xeb   : > { %v528_v63 = vmul.f32 %v485_v14, %v784_v26  ;;  %v471_v55 = vmul.f32 %v671_v60, %v470_v61 }
  0xec   : > { %v549_v11 = vmul.f32 %v899_v44, %v529_v34  ;;  %v510_v3 = vsub.f32 1.5, %v509_v52  ;;  %v500_v46 = vsub.f32 1.5, %v499_v21 }
  0xed   : > { %v548_v6 = vmul.f32 %v899_v44, %v528_v63  ;;  %v475_v25 = vsel %vm474_vm13, %v671_v60, %v471_v55 }
  0xee   : > { %565 = vst.msk [vmem:[%s920_s20 + $0x68] sm:$0xff] %vm163_vm0, %v549_v11  ;;  %v511_v43 = vmul.f32 %v673_v13, %v510_v3  ;;  %v527_v26 = vmul.f32 %v475_v25, %v763_v18  ;;  %v501_v57 = vmul.f32 %v675_v56, %v500_v46 }
  0xef   : > { %564 = vst.msk [vmem:[%s920_s20 + $0x60] sm:$0xff] %vm163_vm0, %v548_v6 }
  0xf0   : > { %v515_v5 = vsel %vm514_vm15, %v673_v13, %v511_v43  ;;  %v547_v30 = vmul.f32 %v899_v44, %v527_v26  ;;  %v505_v16 = vsel %vm504_vm3, %v675_v56, %v501_v57 }
  0xf1   : > { %v531_v0 = vmul.f32 %v515_v5, %v797_v32  ;;  %v530_v18 = vmul.f32 %v505_v16, %v778_v24 }
  0xf2   : > { %563 = vst.msk [vmem:[%s920_s20 + $0x58] sm:$0xff] %vm163_vm0, %v547_v30 }
  0xf3   : > { %v551_v31 = vmul.f32 %v899_v44, %v531_v0  ;;  %v550_v17 = vmul.f32 %v899_v44, %v530_v18 }
  0xf5   : > { %567 = vst.msk [vmem:[%s920_s20 + $0x78] sm:$0xff] %vm163_vm0, %v551_v31 }
  0xf6   : > { %566 = vst.msk [vmem:[%s920_s20 + $0x70] sm:$0xff] %vm163_vm0, %v550_v17 }
  0xf7 PF: > { %s12_s9 = sadd.s32 1, %s682_s9  }
  0xf8   : > { %p9_p4 = scmp.ge.s32.totalorder %s12_s9, 6  }
  0xfa   :  { %11 = sbr.rel (!%p9_p4) target bundleno = 1 (0x1), region = 58 }

</bundles_post_ra>
